<compile_context>
chip_gen: v6e
topology: v6e:2x2x1
jax: 0.10.0
libtpu: 0.0.40
codegen_flags: <defaults>
</compile_context>

<pallas_src>
import functools
import math

import jax
import jax.numpy as jnp
import numpy as np
from jax.experimental import pallas as pl
from jax.experimental.pallas import tpu as pltpu


# ----------------------------------------------------------------------------
# Fused MHA kernel: single invocation, everything resident in VMEM.
# ----------------------------------------------------------------------------
def _mha_fused_kernel(x_q_ref, x_k_ref, x_v_ref, bias_ref,
                      wq_ref, bq_ref, wk_ref, bk_ref, wv_ref, bv_ref,
                      wo_ref, bo_ref, o_ref, attn_scr, *, n_head, scale):
    # x_*_ref, o_ref : [S*B, d_model]   packed tokens, row r = s*B + b
    # bias_ref       : [S*B, S*B] f32 additive bias: 0 where attention allowed,
    #                  -1e30 where masked OR tokens belong to different batches
    # w*_ref         : [d_model, d_model], b*_ref : [1, d_model]
    # attn_scr       : [S*B, d_model] f32 VMEM scratch (concatenated heads)
    x_q = x_q_ref[...]
    x_k = x_k_ref[...]
    x_v = x_v_ref[...]
    bias = bias_ref[...]

    # Q/K/V projections as single tall matmuls over M = seq*batch (MXU, f32
    # accumulation).  The 1/sqrt(d_model) scale is folded into q once.
    # TODO(synk): on v6e/v7x cast matmul operands to bf16 (keeping
    # preferred_element_type=f32) for ~2-4x MXU rate; that breaks this script's
    # 1e-5 parity check, so kept f32 here.
    q_p = (jnp.dot(x_q, wq_ref[...], preferred_element_type=jnp.float32)
           + bq_ref[...]) * scale
    k_p = jnp.dot(x_k, wk_ref[...], preferred_element_type=jnp.float32) + bk_ref[...]
    v_p = jnp.dot(x_v, wv_ref[...], preferred_element_type=jnp.float32) + bv_ref[...]

    m, d_model = q_p.shape            # m = seq*batch
    d_head = d_model // n_head

    # Per-head attention over the packed token axis.  The additive bias kills
    # cross-batch and masked scores, so this matches per-batch attention
    # exactly (their exp underflows to 0 in the softmax denominator).
    # Head outputs land in attn_scr[:, h*dh:(h+1)*dh]; a SINGLE full-K output
    # projection follows the loop (amortizes the Wo weight push n_head times).
    # TODO(synk): for large n_head use lax.fori_loop(+pl.ds) to bound live
    #             ranges; for large seq switch to flash-style KV tiling with an
    #             online softmax instead of the full [m, m] score matrix, and
    #             re-derive tiles / vmem_limit_bytes for v7x's 64 MiB VMEM.
    for h in range(n_head):
        lo = h * d_head
        hi = lo + d_head
        qh = q_p[:, lo:hi]            # [m, dh]
        kh = k_p[:, lo:hi]            # [m, dh]
        vh = v_p[:, lo:hi]            # [m, dh]

        # Contract the d_head axes directly (no transpose of a lane-sparse tile).
        scores = jax.lax.dot_general(
            qh, kh, (((1,), (1,)), ((), ())),
            preferred_element_type=jnp.float32) + bias          # [m, m]

        mx = jnp.max(scores, axis=-1, keepdims=True)
        e = jnp.exp(scores - mx)
        denom = jnp.sum(e, axis=-1, keepdims=True)

        # Deferred normalization: unnormalized e @ v first, then scale the
        # [m, d_head] result instead of the [m, m] probability matrix.
        # (approx=True would route the reciprocal to the EUP slot; kept exact
        # for the 1e-5 parity check.)
        head_o = jnp.dot(e, vh, preferred_element_type=jnp.float32)        # [m, dh]
        attn_scr[:, lo:hi] = head_o * pl.reciprocal(denom, approx=False)

    # Single output projection with full contraction K = d_model.
    o_ref[...] = (jnp.dot(attn_scr[...], wo_ref[...],
                          preferred_element_type=jnp.float32) + bo_ref[...])


# ----------------------------------------------------------------------------
# Wrapper: one grid-less pallas_call, no transposes anywhere.
# ----------------------------------------------------------------------------
@functools.partial(jax.jit, static_argnames=("n_head",))
def multi_head_attention(q, k, v, mask, params, n_head):
    """q, k, v: [seq_len, batch, d_model]; mask: [seq, seq] bool (True = masked),
    shared across batch and heads (mirrors the PyTorch module)."""
    seq_len, batch, d_model = q.shape
    m = seq_len * batch
    scale = 1.0 / math.sqrt(d_model)   # module divides by sqrt(d_model), not sqrt(d_head)

    # Free, contiguous reshapes (no data movement): packed token matrices.
    q2 = q.reshape(m, d_model)
    k2 = k.reshape(m, d_model)
    v2 = v.reshape(m, d_model)

    # Additive f32 attention bias over packed tokens: -1e30 where the user mask
    # masks (s_q, s_k) OR the two tokens belong to different batch elements.
    # Note: a fully-masked row gives a uniform attention row here, whereas the
    # -inf reference would give NaN; identical for causal masks.
    # TODO(synk): when the mask is known-causal, generate this bias in-kernel
    # from two broadcasted_iota instead of passing an O((S*B)^2) input.
    neg = jnp.float32(-1e30)
    masked = mask.astype(bool)                                              # [S, S]
    cross_batch = jnp.arange(batch)[:, None] != jnp.arange(batch)[None, :]  # [B, B]
    packed_masked = masked[:, None, :, None] | cross_batch[None, :, None, :]  # [S,B,S,B]
    bias = jnp.where(packed_masked, neg, jnp.float32(0.0)).reshape(m, m)

    kernel = functools.partial(_mha_fused_kernel, n_head=n_head, scale=scale)

    # No grid: every operand sits whole in VMEM (default BlockSpec = full array
    # in VMEM), so there is zero per-grid-step pipeline overhead and the MXU
    # sees M = seq*batch on every matmul.
    out2 = pl.pallas_call(
        kernel,
        out_shape=jax.ShapeDtypeStruct((m, d_model), jnp.float32),
        scratch_shapes=[pltpu.VMEM((m, d_model), jnp.float32)],
    )(q2, k2, v2, bias,
      params["q_w"], params["q_b"].reshape(1, d_model),
      params["k_w"], params["k_b"].reshape(1, d_model),
      params["v_w"], params["v_b"].reshape(1, d_model),
      params["o_w"], params["o_b"].reshape(1, d_model))

    # Free reshape back to the module's [seq, batch, d_model] layout.
    return out2.reshape(seq_len, batch, d_model)


# ----------------------------------------------------------------------------
# Pure-JAX reference for validation (mirrors the PyTorch module)
# ----------------------------------------------------------------------------
def reference_mha(q, k, v, mask, params, n_head):
    seq_len, batch, d_model = q.shape
    d_head = d_model // n_head

    def lin(x, w, b):
        return x @ w + b

    def head_split(x):  # 's b (nh dh) -> (b nh) s dh'
        x = x.reshape(seq_len, batch, n_head, d_head)
        return jnp.transpose(x, (1, 2, 0, 3)).reshape(batch * n_head, seq_len, d_head)

    q_t = head_split(lin(q, params["q_w"], params["q_b"]))
    k_t = head_split(lin(k, params["k_w"], params["k_b"]))
    v_t = head_split(lin(v, params["v_w"], params["v_b"]))

    scores = jnp.einsum("bqd,bkd->bqk", q_t, k_t) / math.sqrt(d_model)
    scores = jnp.where(mask[None, :, :], -jnp.inf, scores)
    p = jax.nn.softmax(scores, axis=-1)
    attn = jnp.einsum("bqk,bkd->bqd", p, v_t)

    attn = attn.reshape(batch, n_head, seq_len, d_head)
    attn = jnp.transpose(attn, (2, 0, 1, 3)).reshape(seq_len, batch, d_model)
    return lin(attn, params["o_w"], params["o_b"])


# ----------------------------------------------------------------------------
# Main
# ----------------------------------------------------------------------------
if __name__ == "__main__":
    seq_len, batch, d_model, n_head = 8, 2, 32, 4

    key = jax.random.PRNGKey(0)
    keys = jax.random.split(key, 12)

    bound = 1.0 / math.sqrt(d_model)  # nn.Linear-style uniform init
    params = {
        "q_w": jax.random.uniform(keys[0], (d_model, d_model), jnp.float32, -bound, bound),
        "q_b": jax.random.uniform(keys[1], (d_model,), jnp.float32, -bound, bound),
        "k_w": jax.random.uniform(keys[2], (d_model, d_model), jnp.float32, -bound, bound),
        "k_b": jax.random.uniform(keys[3], (d_model,), jnp.float32, -bound, bound),
        "v_w": jax.random.uniform(keys[4], (d_model, d_model), jnp.float32, -bound, bound),
        "v_b": jax.random.uniform(keys[5], (d_model,), jnp.float32, -bound, bound),
        "o_w": jax.random.uniform(keys[6], (d_model, d_model), jnp.float32, -bound, bound),
        "o_b": jax.random.uniform(keys[7], (d_model,), jnp.float32, -bound, bound),
    }

    q = jax.random.normal(keys[8], (seq_len, batch, d_model), jnp.float32)
    k = jax.random.normal(keys[9], (seq_len, batch, d_model), jnp.float32)
    v = jax.random.normal(keys[10], (seq_len, batch, d_model), jnp.float32)

    # Causal mask (True = masked), shared across every (batch, head) slice,
    # mirroring torch's masked_fill semantics with a boolean mask.
    causal = jnp.triu(jnp.ones((seq_len, seq_len), dtype=bool), k=1)

    out = multi_head_attention(q, k, v, causal, params, n_head)
    out = jax.block_until_ready(out)

    ref = reference_mha(q, k, v, causal, params, n_head)
    np.testing.assert_allclose(np.asarray(out), np.asarray(ref), rtol=1e-5, atol=1e-5)

    print("KERNEL_OK")
</pallas_src>

<mosaic_0001>
module attributes {stable_mosaic.version = 11 : i64} {
  func.func @_mha_fused_kernel(%arg0: memref<16x32xf32, #tpu.memory_space<vmem>>, %arg1: memref<16x32xf32, #tpu.memory_space<vmem>>, %arg2: memref<16x32xf32, #tpu.memory_space<vmem>>, %arg3: memref<16x16xf32, #tpu.memory_space<vmem>>, %arg4: memref<32x32xf32, #tpu.memory_space<vmem>>, %arg5: memref<1x32xf32, #tpu.memory_space<vmem>>, %arg6: memref<32x32xf32, #tpu.memory_space<vmem>>, %arg7: memref<1x32xf32, #tpu.memory_space<vmem>>, %arg8: memref<32x32xf32, #tpu.memory_space<vmem>>, %arg9: memref<1x32xf32, #tpu.memory_space<vmem>>, %arg10: memref<32x32xf32, #tpu.memory_space<vmem>>, %arg11: memref<1x32xf32, #tpu.memory_space<vmem>>, %arg12: memref<16x32xf32, #tpu.memory_space<vmem>>, %arg13: memref<16x32xf32, #tpu.memory_space<vmem>>) attributes {dimension_semantics = [], scalar_prefetch = 0 : i64, scratch_operands = 1 : i64, tpu.core_type = #tpu.core_type<tc>} {
    %c0 = arith.constant 0 : index
    %c0_0 = arith.constant 0 : index
    %0 = vector.load %arg0[%c0, %c0_0] : memref<16x32xf32, #tpu.memory_space<vmem>>, vector<16x32xf32>
    %c0_1 = arith.constant 0 : index
    %c0_2 = arith.constant 0 : index
    %1 = vector.load %arg1[%c0_1, %c0_2] : memref<16x32xf32, #tpu.memory_space<vmem>>, vector<16x32xf32>
    %c0_3 = arith.constant 0 : index
    %c0_4 = arith.constant 0 : index
    %2 = vector.load %arg2[%c0_3, %c0_4] : memref<16x32xf32, #tpu.memory_space<vmem>>, vector<16x32xf32>
    %c0_5 = arith.constant 0 : index
    %c0_6 = arith.constant 0 : index
    %3 = vector.load %arg3[%c0_5, %c0_6] : memref<16x16xf32, #tpu.memory_space<vmem>>, vector<16x16xf32>
    %c0_7 = arith.constant 0 : index
    %c0_8 = arith.constant 0 : index
    %4 = vector.load %arg4[%c0_7, %c0_8] : memref<32x32xf32, #tpu.memory_space<vmem>>, vector<32x32xf32>
    %cst = arith.constant dense<0.000000e+00> : vector<16x32xf32>
    %5 = tpu.matmul %0, %4, %cst {dimension_numbers = #tpu.dot_dimension_numbers<[1], [0], [0], [1], [0, 0, 1, 1], [], []>} : vector<16x32xf32>, vector<32x32xf32>, vector<16x32xf32> -> vector<16x32xf32>
    %c0_9 = arith.constant 0 : index
    %c0_10 = arith.constant 0 : index
    %6 = vector.load %arg5[%c0_9, %c0_10] : memref<1x32xf32, #tpu.memory_space<vmem>>, vector<1x32xf32>
    %7 = vector.broadcast %6 : vector<1x32xf32> to vector<16x32xf32>
    %8 = arith.addf %5, %7 : vector<16x32xf32>
    %cst_11 = arith.constant 0.176776692 : f32
    %9 = vector.broadcast %cst_11 : f32 to vector<16x32xf32>
    %10 = arith.mulf %8, %9 : vector<16x32xf32>
    %c0_12 = arith.constant 0 : index
    %c0_13 = arith.constant 0 : index
    %11 = vector.load %arg6[%c0_12, %c0_13] : memref<32x32xf32, #tpu.memory_space<vmem>>, vector<32x32xf32>
    %cst_14 = arith.constant dense<0.000000e+00> : vector<16x32xf32>
    %12 = tpu.matmul %1, %11, %cst_14 {dimension_numbers = #tpu.dot_dimension_numbers<[1], [0], [0], [1], [0, 0, 1, 1], [], []>} : vector<16x32xf32>, vector<32x32xf32>, vector<16x32xf32> -> vector<16x32xf32>
    %c0_15 = arith.constant 0 : index
    %c0_16 = arith.constant 0 : index
    %13 = vector.load %arg7[%c0_15, %c0_16] : memref<1x32xf32, #tpu.memory_space<vmem>>, vector<1x32xf32>
    %14 = vector.broadcast %13 : vector<1x32xf32> to vector<16x32xf32>
    %15 = arith.addf %12, %14 : vector<16x32xf32>
    %c0_17 = arith.constant 0 : index
    %c0_18 = arith.constant 0 : index
    %16 = vector.load %arg8[%c0_17, %c0_18] : memref<32x32xf32, #tpu.memory_space<vmem>>, vector<32x32xf32>
    %cst_19 = arith.constant dense<0.000000e+00> : vector<16x32xf32>
    %17 = tpu.matmul %2, %16, %cst_19 {dimension_numbers = #tpu.dot_dimension_numbers<[1], [0], [0], [1], [0, 0, 1, 1], [], []>} : vector<16x32xf32>, vector<32x32xf32>, vector<16x32xf32> -> vector<16x32xf32>
    %c0_20 = arith.constant 0 : index
    %c0_21 = arith.constant 0 : index
    %18 = vector.load %arg9[%c0_20, %c0_21] : memref<1x32xf32, #tpu.memory_space<vmem>>, vector<1x32xf32>
    %19 = vector.broadcast %18 : vector<1x32xf32> to vector<16x32xf32>
    %20 = arith.addf %17, %19 : vector<16x32xf32>
    %21 = vector.extract_strided_slice %10 {offsets = [0, 0], sizes = [16, 8], strides = [1, 1]} : vector<16x32xf32> to vector<16x8xf32>
    %22 = vector.extract_strided_slice %15 {offsets = [0, 0], sizes = [16, 8], strides = [1, 1]} : vector<16x32xf32> to vector<16x8xf32>
    %23 = vector.extract_strided_slice %20 {offsets = [0, 0], sizes = [16, 8], strides = [1, 1]} : vector<16x32xf32> to vector<16x8xf32>
    %cst_22 = arith.constant dense<0.000000e+00> : vector<16x16xf32>
    %24 = tpu.matmul %21, %22, %cst_22 {dimension_numbers = #tpu.dot_dimension_numbers<[1], [1], [0], [0], [0, 0, 1, 0], [], []>} : vector<16x8xf32>, vector<16x8xf32>, vector<16x16xf32> -> vector<16x16xf32>
    %25 = arith.addf %24, %3 : vector<16x16xf32>
    %cst_23 = arith.constant dense<0xFF800000> : vector<16xf32>
    %26 = vector.multi_reduction <maximumf>, %25, %cst_23 [1] : vector<16x16xf32> to vector<16xf32>
    %27 = vector.shape_cast %26 : vector<16xf32> to vector<16x1xf32>
    %28 = vector.broadcast %27 : vector<16x1xf32> to vector<16x16xf32>
    %29 = arith.subf %25, %28 : vector<16x16xf32>
    %30 = math.exp %29 : vector<16x16xf32>
    %cst_24 = arith.constant dense<0.000000e+00> : vector<16xf32>
    %31 = vector.multi_reduction <add>, %30, %cst_24 [1] : vector<16x16xf32> to vector<16xf32>
    %32 = vector.shape_cast %31 : vector<16xf32> to vector<16x1xf32>
    %cst_25 = arith.constant dense<0.000000e+00> : vector<16x8xf32>
    %33 = tpu.matmul %30, %23, %cst_25 {dimension_numbers = #tpu.dot_dimension_numbers<[1], [0], [0], [1], [0, 0, 1, 1], [], []>} : vector<16x16xf32>, vector<16x8xf32>, vector<16x8xf32> -> vector<16x8xf32>
    %34 = tpu.reciprocal %32 : vector<16x1xf32> -> vector<16x1xf32>
    %35 = vector.broadcast %34 : vector<16x1xf32> to vector<16x8xf32>
    %36 = arith.mulf %33, %35 : vector<16x8xf32>
    %c0_26 = arith.constant 0 : index
    %c0_27 = arith.constant 0 : index
    %37 = vector.load %arg13[%c0_26, %c0_27] : memref<16x32xf32, #tpu.memory_space<vmem>>, vector<16x8xf32>
    tpu.vector_store %arg13[%c0_26, %c0_27], %36 {strides = array<i32>} : memref<16x32xf32, #tpu.memory_space<vmem>>, vector<16x8xf32>,
    %38 = vector.extract_strided_slice %10 {offsets = [0, 8], sizes = [16, 8], strides = [1, 1]} : vector<16x32xf32> to vector<16x8xf32>
    %39 = vector.extract_strided_slice %15 {offsets = [0, 8], sizes = [16, 8], strides = [1, 1]} : vector<16x32xf32> to vector<16x8xf32>
    %40 = vector.extract_strided_slice %20 {offsets = [0, 8], sizes = [16, 8], strides = [1, 1]} : vector<16x32xf32> to vector<16x8xf32>
    %cst_28 = arith.constant dense<0.000000e+00> : vector<16x16xf32>
    %41 = tpu.matmul %38, %39, %cst_28 {dimension_numbers = #tpu.dot_dimension_numbers<[1], [1], [0], [0], [0, 0, 1, 0], [], []>} : vector<16x8xf32>, vector<16x8xf32>, vector<16x16xf32> -> vector<16x16xf32>
    %42 = arith.addf %41, %3 : vector<16x16xf32>
    %cst_29 = arith.constant dense<0xFF800000> : vector<16xf32>
    %43 = vector.multi_reduction <maximumf>, %42, %cst_29 [1] : vector<16x16xf32> to vector<16xf32>
    %44 = vector.shape_cast %43 : vector<16xf32> to vector<16x1xf32>
    %45 = vector.broadcast %44 : vector<16x1xf32> to vector<16x16xf32>
    %46 = arith.subf %42, %45 : vector<16x16xf32>
    %47 = math.exp %46 : vector<16x16xf32>
    %cst_30 = arith.constant dense<0.000000e+00> : vector<16xf32>
    %48 = vector.multi_reduction <add>, %47, %cst_30 [1] : vector<16x16xf32> to vector<16xf32>
    %49 = vector.shape_cast %48 : vector<16xf32> to vector<16x1xf32>
    %cst_31 = arith.constant dense<0.000000e+00> : vector<16x8xf32>
    %50 = tpu.matmul %47, %40, %cst_31 {dimension_numbers = #tpu.dot_dimension_numbers<[1], [0], [0], [1], [0, 0, 1, 1], [], []>} : vector<16x16xf32>, vector<16x8xf32>, vector<16x8xf32> -> vector<16x8xf32>
    %51 = tpu.reciprocal %49 : vector<16x1xf32> -> vector<16x1xf32>
    %52 = vector.broadcast %51 : vector<16x1xf32> to vector<16x8xf32>
    %53 = arith.mulf %50, %52 : vector<16x8xf32>
    %c0_32 = arith.constant 0 : index
    %c8 = arith.constant 8 : index
    %54 = vector.load %arg13[%c0_32, %c8] : memref<16x32xf32, #tpu.memory_space<vmem>>, vector<16x8xf32>
    tpu.vector_store %arg13[%c0_32, %c8], %53 {strides = array<i32>} : memref<16x32xf32, #tpu.memory_space<vmem>>, vector<16x8xf32>,
    %55 = vector.extract_strided_slice %10 {offsets = [0, 16], sizes = [16, 8], strides = [1, 1]} : vector<16x32xf32> to vector<16x8xf32>
    %56 = vector.extract_strided_slice %15 {offsets = [0, 16], sizes = [16, 8], strides = [1, 1]} : vector<16x32xf32> to vector<16x8xf32>
    %57 = vector.extract_strided_slice %20 {offsets = [0, 16], sizes = [16, 8], strides = [1, 1]} : vector<16x32xf32> to vector<16x8xf32>
    %cst_33 = arith.constant dense<0.000000e+00> : vector<16x16xf32>
    %58 = tpu.matmul %55, %56, %cst_33 {dimension_numbers = #tpu.dot_dimension_numbers<[1], [1], [0], [0], [0, 0, 1, 0], [], []>} : vector<16x8xf32>, vector<16x8xf32>, vector<16x16xf32> -> vector<16x16xf32>
    %59 = arith.addf %58, %3 : vector<16x16xf32>
    %cst_34 = arith.constant dense<0xFF800000> : vector<16xf32>
    %60 = vector.multi_reduction <maximumf>, %59, %cst_34 [1] : vector<16x16xf32> to vector<16xf32>
    %61 = vector.shape_cast %60 : vector<16xf32> to vector<16x1xf32>
    %62 = vector.broadcast %61 : vector<16x1xf32> to vector<16x16xf32>
    %63 = arith.subf %59, %62 : vector<16x16xf32>
    %64 = math.exp %63 : vector<16x16xf32>
    %cst_35 = arith.constant dense<0.000000e+00> : vector<16xf32>
    %65 = vector.multi_reduction <add>, %64, %cst_35 [1] : vector<16x16xf32> to vector<16xf32>
    %66 = vector.shape_cast %65 : vector<16xf32> to vector<16x1xf32>
    %cst_36 = arith.constant dense<0.000000e+00> : vector<16x8xf32>
    %67 = tpu.matmul %64, %57, %cst_36 {dimension_numbers = #tpu.dot_dimension_numbers<[1], [0], [0], [1], [0, 0, 1, 1], [], []>} : vector<16x16xf32>, vector<16x8xf32>, vector<16x8xf32> -> vector<16x8xf32>
    %68 = tpu.reciprocal %66 : vector<16x1xf32> -> vector<16x1xf32>
    %69 = vector.broadcast %68 : vector<16x1xf32> to vector<16x8xf32>
    %70 = arith.mulf %67, %69 : vector<16x8xf32>
    %c0_37 = arith.constant 0 : index
    %c16 = arith.constant 16 : index
    %71 = vector.load %arg13[%c0_37, %c16] : memref<16x32xf32, #tpu.memory_space<vmem>>, vector<16x8xf32>
    tpu.vector_store %arg13[%c0_37, %c16], %70 {strides = array<i32>} : memref<16x32xf32, #tpu.memory_space<vmem>>, vector<16x8xf32>,
    %72 = vector.extract_strided_slice %10 {offsets = [0, 24], sizes = [16, 8], strides = [1, 1]} : vector<16x32xf32> to vector<16x8xf32>
    %73 = vector.extract_strided_slice %15 {offsets = [0, 24], sizes = [16, 8], strides = [1, 1]} : vector<16x32xf32> to vector<16x8xf32>
    %74 = vector.extract_strided_slice %20 {offsets = [0, 24], sizes = [16, 8], strides = [1, 1]} : vector<16x32xf32> to vector<16x8xf32>
    %cst_38 = arith.constant dense<0.000000e+00> : vector<16x16xf32>
    %75 = tpu.matmul %72, %73, %cst_38 {dimension_numbers = #tpu.dot_dimension_numbers<[1], [1], [0], [0], [0, 0, 1, 0], [], []>} : vector<16x8xf32>, vector<16x8xf32>, vector<16x16xf32> -> vector<16x16xf32>
    %76 = arith.addf %75, %3 : vector<16x16xf32>
    %cst_39 = arith.constant dense<0xFF800000> : vector<16xf32>
    %77 = vector.multi_reduction <maximumf>, %76, %cst_39 [1] : vector<16x16xf32> to vector<16xf32>
    %78 = vector.shape_cast %77 : vector<16xf32> to vector<16x1xf32>
    %79 = vector.broadcast %78 : vector<16x1xf32> to vector<16x16xf32>
    %80 = arith.subf %76, %79 : vector<16x16xf32>
    %81 = math.exp %80 : vector<16x16xf32>
    %cst_40 = arith.constant dense<0.000000e+00> : vector<16xf32>
    %82 = vector.multi_reduction <add>, %81, %cst_40 [1] : vector<16x16xf32> to vector<16xf32>
    %83 = vector.shape_cast %82 : vector<16xf32> to vector<16x1xf32>
    %cst_41 = arith.constant dense<0.000000e+00> : vector<16x8xf32>
    %84 = tpu.matmul %81, %74, %cst_41 {dimension_numbers = #tpu.dot_dimension_numbers<[1], [0], [0], [1], [0, 0, 1, 1], [], []>} : vector<16x16xf32>, vector<16x8xf32>, vector<16x8xf32> -> vector<16x8xf32>
    %85 = tpu.reciprocal %83 : vector<16x1xf32> -> vector<16x1xf32>
    %86 = vector.broadcast %85 : vector<16x1xf32> to vector<16x8xf32>
    %87 = arith.mulf %84, %86 : vector<16x8xf32>
    %c0_42 = arith.constant 0 : index
    %c24 = arith.constant 24 : index
    %88 = vector.load %arg13[%c0_42, %c24] : memref<16x32xf32, #tpu.memory_space<vmem>>, vector<16x8xf32>
    tpu.vector_store %arg13[%c0_42, %c24], %87 {strides = array<i32>} : memref<16x32xf32, #tpu.memory_space<vmem>>, vector<16x8xf32>,
    %c0_43 = arith.constant 0 : index
    %c0_44 = arith.constant 0 : index
    %89 = vector.load %arg13[%c0_43, %c0_44] : memref<16x32xf32, #tpu.memory_space<vmem>>, vector<16x32xf32>
    %c0_45 = arith.constant 0 : index
    %c0_46 = arith.constant 0 : index
    %90 = vector.load %arg10[%c0_45, %c0_46] : memref<32x32xf32, #tpu.memory_space<vmem>>, vector<32x32xf32>
    %cst_47 = arith.constant dense<0.000000e+00> : vector<16x32xf32>
    %91 = tpu.matmul %89, %90, %cst_47 {dimension_numbers = #tpu.dot_dimension_numbers<[1], [0], [0], [1], [0, 0, 1, 1], [], []>} : vector<16x32xf32>, vector<32x32xf32>, vector<16x32xf32> -> vector<16x32xf32>
    %c0_48 = arith.constant 0 : index
    %c0_49 = arith.constant 0 : index
    %92 = vector.load %arg11[%c0_48, %c0_49] : memref<1x32xf32, #tpu.memory_space<vmem>>, vector<1x32xf32>
    %93 = vector.broadcast %92 : vector<1x32xf32> to vector<16x32xf32>
    %94 = arith.addf %91, %93 : vector<16x32xf32>
    %c0_50 = arith.constant 0 : index
    %c0_51 = arith.constant 0 : index
    %95 = vector.load %arg12[%c0_50, %c0_51] : memref<16x32xf32, #tpu.memory_space<vmem>>, vector<16x32xf32>
    tpu.vector_store %arg12[%c0_50, %c0_51], %94 {strides = array<i32>} : memref<16x32xf32, #tpu.memory_space<vmem>>, vector<16x32xf32>,
    return
  }
}

</mosaic_0001>

<bundles_post_ra>
// kernel: multi_head_attention.1
= control target key start
LH: loop header
LB: loop body
LE: loop exit
PB: predicated region body
PF: predicated region fallthrough
CT: control target
= control target key end

     0   :  { %vm61_vm0 = vcmask 261120   ;;  %s1848_s0 = inlined_call_operand.vmem [shape: f32[16,32], index: 0, kind: input, shape index: {}]   ;;  %s1849_s1 = inlined_call_operand.vmem [shape: f32[16,32], index: 1, kind: input, shape index: {}]   ;;  %s1850_s2 = inlined_call_operand.vmem [shape: f32[16,32], index: 2, kind: input, shape index: {}]   ;;  %s1851_s3 = inlined_call_operand.vmem [shape: f32[16,16], index: 3, kind: input, shape index: {}]   ;;  %s1852_s4 = inlined_call_operand.vmem [shape: f32[32,32], index: 4, kind: input, shape index: {}]   ;;  %s1853_s5 = inlined_call_operand.vmem [shape: f32[1,32], index: 5, kind: input, shape index: {}]   ;;  %s1854_s6 = inlined_call_operand.vmem [shape: f32[32,32], index: 6, kind: input, shape index: {}]   ;;  %s1855_s7 = inlined_call_operand.vmem [shape: f32[1,32], index: 7, kind: input, shape index: {}]   ;;  %s1856_s8 = inlined_call_operand.vmem [shape: f32[32,32], index: 8, kind: input, shape index: {}]   ;;  %s1857_s9 = inlined_call_operand.vmem [shape: f32[1,32], index: 9, kind: input, shape index: {}]   ;;  %s1858_s10 = inlined_call_operand.vmem [shape: f32[32,32], index: 10, kind: input, shape index: {}]   ;;  %s1859_s11 = inlined_call_operand.vmem [shape: f32[1,32], index: 11, kind: input, shape index: {}]   ;;  %s1860_s12 = inlined_call_operand.hbm [shape: f32[16,32], index: 12, kind: output, shape index: {}]  }
   0x1   :  { %v148_v0 = vld [vmem:[%s1854_s6 + $0x18] sm:$0xff]  ;;  %v147_v2 = vld [vmem:[%s1854_s6 + $0x10] sm:$0xff]  ;;  %v146_v4 = vld [vmem:[%s1854_s6 + $0x8] sm:$0xff] }
   0x2   :  { %v53_v1 = vld [vmem:[%s1852_s4 + $0x18] sm:$0xff]  ;;  %1373 = vmatprep.subr.mxu1 %v148_v0  ;;  %v52_v3 = vld [vmem:[%s1852_s4 + $0x10] sm:$0xff]  ;;  %v51_v5 = vld [vmem:[%s1852_s4 + $0x8] sm:$0xff] }
   0x3   :  { %1362 = vmatprep.subr.mxu0 %v53_v1  ;;  %1374 = vmatpush3.msra.mxu1 %v148_v0  ;;  %v145_v6 = vld [vmem:[%s1854_s6] sm:$0xff] }
   0x4   :  { %1363 = vmatpush3.msra.mxu0 %v53_v1  ;;  %1375 = vmatprep.subr.mxu1 %v147_v2  ;;  %v50_v7 = vld [vmem:[%s1852_s4] sm:$0xff] }
   0x5   :  { %1364 = vmatprep.subr.mxu0 %v52_v3  ;;  %1376 = vmatpush3.msra.mxu1 %v147_v2  ;;  %v44_v8 = vld [vmem:[%s1849_s1] sm:$0xff] }
   0x6   :  { %1365 = vmatpush3.msra.mxu0 %v52_v3  ;;  %1377 = vmatprep.subr.mxu1 %v146_v4  ;;  %v42_v9 = vld [vmem:[%s1848_s0] sm:$0xff] }
   0x7   :  { %1366 = vmatprep.subr.mxu0 %v51_v5  ;;  %1378 = vmatpush3.msra.mxu1 %v146_v4 }
   0x8   :  { %1367 = vmatpush3.msra.mxu0 %v51_v5 }
   0x9   :  { %17 = vsyncpa [#allocation4], 0  ;;  %1379 = vmatprep.subr.mxu1 %v145_v6  ;;  %1368 = vmatprep.subr.mxu0 %v50_v7  ;;  %v45_v10 = vld [vmem:[%s1849_s1 + $0x8] sm:$0xff]  ;;  %v240_v12 = vld [vmem:[%s1856_s8 + $0x18] sm:$0xff]  ;;  %vm329_vm1 = vcmask 64512   ;;  %vm417_vm2 = vcmask 130048  }
   0xa   :  { %v43_v11 = vld [vmem:[%s1848_s0 + $0x8] sm:$0xff]  ;;  %1380 = vmatpush3.msra.mxu1 %v145_v6  ;;  %1381 = vmatprep.mubr.msk.f32.mxu1 %vm61_vm0, %v44_v8  ;;  %v46_v13 = vld [vmem:[%s1850_s2] sm:$0xff]  ;;  %v239_v14 = vld [vmem:[%s1856_s8 + $0x10] sm:$0xff]  ;;  %s1527_s23 = smov 8   ;;  %s1528_s4 = smov 16   ;;  %vm733_vm3 = vcmask 130112  }
   0xb   :  { %1369 = vmatpush3.msra.mxu0 %v50_v7  ;;  %1370 = vmatprep.mubr.msk.f32.mxu0 %vm61_vm0, %v42_v9  ;;  %v238_v15 = vld [vmem:[%s1856_s8 + $0x8] sm:$0xff]  ;;  %v237_v16 = vld [vmem:[%s1856_s8] sm:$0xff]  ;;  %s1525_s8 = smov 112   ;;  %vm944_vm4 = vcmask 195712   ;;  %s1529_s30 = smov 24   ;;  %vm1155_vm5 = vcmask 261312  }
   0xc   :  { %1382 = vmatmul.mubr.msk.f32.vlgmr.msra.gmra.mxu1 %vm61_vm0, %v45_v10  ;;  %1371 = vmatmul.mubr.msk.f32.vlgmr.msra.gmra.mxu0 %vm61_vm0, %v43_v11  ;;  %v47_v17 = vld [vmem:[%s1850_s2 + $0x8] sm:$0xff]  ;;  %v1273_v18 = vld [vmem:[%s1855_s7] ss:$0 sm:$0xff]  ;;  %s1524_s2 = smov 120   ;;  %s1530_s14 = smov [#allocation3]  }
   0xd   :  { %1384 = vmatprep.subr.mxu0 %v240_v12  ;;  %1392 = vmatprep.mubr.msk.f32.mxu0 %vm61_vm0, %v46_v13  ;;  %v1270_v21 = vld [vmem:[%s1853_s5] ss:$0 sm:$0xff]  ;;  %v1715_v41 = vld [vmem:[%s1851_s3 + $0x8] sm:$0xff]  ;;  %s1259_s15 = sshll.u32 %s1530_s14, 4  ;;  %s1260_s15 = int_to_ptr.vmem [resolvable:$true] %s1259_s15 }
   0xe   :  { %1385 = vmatpush3.msra.mxu0 %v240_v12  ;;  %v1276_v29 = vld [vmem:[%s1857_s9] ss:$0 sm:$0xff]  ;;  %s1502_s16 = scalar_lea.vmem %s1260_s15, 256  ;;  %p1507_p1 = scmp.lt.s32.totalorder %s1260_s15, %s1260_s15 }
   0xf   :  { %1386 = vmatprep.subr.mxu0 %v239_v14  ;;  %v1710_v40 = vld [vmem:[%s1851_s3] sm:$0xff]  ;;  %s1526_s3 = smov 104   ;;  %p1503_p0 = scmp.ne.s32.totalorder %s1260_s15, %s1502_s16 }
  0x10   :  { %1387 = vmatpush3.msra.mxu0 %v239_v14  ;;  %p1508_p2 = scmp.lt.s32.totalorder %s1502_s16, %s1502_s16 }
  0x11   :  { %1388 = vmatprep.subr.mxu0 %v238_v15 }
  0x12   :  { %1389 = vmatpush3.msra.mxu0 %v238_v15  ;;  %p1509_p3 = por %p1508_p2, %p1507_p1 }
  0x13   :  { %1390 = vmatprep.subr.mxu0 %v237_v16 }
  0x14   :  { %1391 = vmatpush3.msra.mxu0 %v237_v16  ;;  %p1510_p4 = pnand %p1509_p3, %p1503_p0 }
  0x15   :  { %1393 = vmatmul.mubr.msk.f32.vlgmr.msra.gmra.mxu0 %vm61_vm0, %v47_v17 }
  0xcc   :  { %v1383_v19 = vpop.f32.mrf.mxu1  ;;  %v1372_v20 = vpop.f32.mrf.mxu0 }
  0xcd   :  { %v1663_v22 = vadd.f32 %v1383_v19, %v1273_v18  ;;  %v140_v27 = vadd.f32 %v1372_v20, %v1270_v21 }
  0xce   :  { %v228_v23 = vpop.f32.mrf.mxu1  ;;  %v134_v24 = vpop.f32.mrf.mxu0 }
  0xcf   :  { %v1665_v25 = vadd.f32 %v1273_v18, %v228_v23  ;;  %529 = vrot.lane.b32.xlu1 %v1663_v22, %s1524_s2  ;;  %v135_v26 = vadd.f32 %v1270_v21, %v134_v24  ;;  %1395 = vmatprep.subr.msk.mxu1 %vm329_vm1, %v1663_v22  ;;  %v1686_v30 = vmul.f32 0.17677669, %v140_v27 }
  0xd0   :  { %1396 = vmatpush3.xpose.msk.msra.mxu1 %vm329_vm1, %v1663_v22 }
  0xd1   :  { %v1673_v28 = vmul.f32 0.17677669, %v135_v26  ;;  %1397 = vmatprep.subr.msk.mxu1 %vm329_vm1, %v1665_v25 }
  0xd3   :  { %527 = vrot.lane.b32.xlu1 %v1665_v25, %s1524_s2  ;;  %1399 = vmatprep.mubr.msk.f32.mxu1 %vm329_vm1, %v1673_v28 }
  0xd4   :  { %1398 = vmatpush3.xpose.msk.msra.mxu1 %vm329_vm1, %v1665_v25 }
  0xd5   :  { %v1394_v31 = vpop.f32.mrf.mxu0 }
  0xd6   :  { %v1688_v32 = vadd.f32 %v1394_v31, %v1276_v29 }
  0xd7   :  { %525 = vrot.lane.b32.xlu1 %v1686_v30, %s1524_s2  ;;  %1400 = vmatmul.mubr.msk.f32.vlgmr.msra.gmra.mxu1 %vm329_vm1, %v1686_v30  ;;  %v320_v33 = vpop.f32.mrf.mxu0 }
  0xd8   :  { %v1694_v34 = vadd.f32 %v1276_v29, %v320_v33  ;;  %1402 = vmatprep.subr.mxu1 %v1688_v32 }
  0xd9   :  { %1403 = vmatpush3.msra.mxu1 %v1688_v32 }
  0xda   :  { %1404 = vmatprep.subr.mxu1 %v1694_v34 }
  0xdb   :  { %636 = vrot.lane.b32.xlu1 %v1688_v32, %s1524_s2  ;;  %1405 = vmatpush3.msra.mxu1 %v1694_v34 }
  0xdf   :  { %742 = vrot.lane.b32.xlu1 %v1663_v22, %s1525_s8 }
  0xe3   :  { %740 = vrot.lane.b32.xlu1 %v1665_v25, %s1525_s8 }
 0x141   :  { %v530_v35 = vpop.permute.xlu1 %529 }
 0x142   :  { %1409 = vmatprep.subr.msk.mxu1 %vm329_vm1, %v530_v35 }
 0x145   :  { %v528_v36 = vpop.permute.xlu1 %527 }
 0x149   :  { %v526_v37 = vpop.permute.xlu1 %525 }
 0x14d   :  { %v637_v38 = vpop.permute.xlu1 %636 }
 0x14e   :  { %1416 = vmatprep.subr.mxu0 %v637_v38 }
 0x14f   :  { %1417 = vmatpush3.msra.mxu0 %v637_v38 }
 0x151   :  { %v743_v0 = vpop.permute.xlu1 %742 }
 0x155   :  { %v741_v1 = vpop.permute.xlu1 %740 }
 0x197   :  { %v1401_v39 = vpop.f32.mrf.mxu1 }
 0x198   :  { %v414_v44 = vadd.f32 %v1401_v39, %v1715_v41 }
 0x199   :  { %v408_v42 = vpop.f32.mrf.mxu1 }
 0x19a   :  { %v409_v43 = vadd.f32 %v408_v42, %v1710_v40  ;;  %v421_v46 = vsel %vm417_vm2, %v414_v44, -inf }
 0x19c   :  { %v418_v45 = vsel %vm417_vm2, %v409_v43, -inf }
 0x19d   :  { %419 = vmax.xlane.f32.xlu0 %v418_v45 }
 0x1a1   :  { %422 = vmax.xlane.f32.xlu0 %v421_v46 }
 0x1b7   :  { %523 = vrot.lane.b32.xlu0 %v1673_v28, %s1524_s2 }
 0x226   :  { %v420_v47 = vpop.xlane.xlu0 %419 }
 0x227   :  { %v424_v48 = vsub.f32 %v409_v43, %v420_v47 }
 0x229   :  { %v426_v49 = vmul.f32 1.442695, %v424_v48 }
 0x22a   :  { %v423_v50 = vpop.xlane.xlu0 %422 }
 0x22b   :  { %1470 = vpow2.f32 %v426_v49  ;;  %v425_v51 = vsub.f32 %v414_v44, %v423_v50 }
 0x22d   :  { %v428_v52 = vmul.f32 1.442695, %v425_v51 }
 0x22e   :  { %v524_v55 = vpop.permute.xlu0 %523 }
 0x22f   :  { %1472 = vpow2.f32 %v428_v52 }
 0x238   :  { %v1723_v53 = vpop.eup %1470 }
 0x239   :  { %1406 = vmatprep.mubr.msk.f32.mxu1 %vm417_vm2, %v1723_v53 }
 0x23c   :  { %v1727_v54 = vpop.eup %1472 }
 0x23d   :  { %1407 = vmatmul.mubr.msk.f32.vlgmr.msra.gmra.mxu1 %vm417_vm2, %v1727_v54 }
 0x23e   :  { %1410 = vmatpush3.xpose.msk.msra.mxu1 %vm329_vm1, %v530_v35  ;;  %1413 = vmatprep.mubr.msk.f32.mxu1 %vm329_vm1, %v524_v55 }
 0x23f   :  { %1411 = vmatprep.subr.msk.mxu1 %vm329_vm1, %v528_v36 }
 0x242   :  { %1412 = vmatpush3.xpose.msk.msra.mxu1 %vm329_vm1, %v528_v36 }
 0x245   :  { %1414 = vmatmul.mubr.msk.f32.vlgmr.msra.gmra.mxu1 %vm329_vm1, %v526_v37 }
 0x2fd   :  { %v1736_v56 = vpop.f32.mrf.mxu1 }
 0x2ff   :  { %v1738_v57 = vpop.f32.mrf.mxu1 }
 0x305   :  { %v1415_v58 = vpop.f32.mrf.mxu1 }
 0x306   :  { %v611_v59 = vadd.f32 %v1415_v58, %v1715_v41 }
 0x307   :  { %v605_v60 = vpop.f32.mrf.mxu1 }
 0x308   :  { %v606_v61 = vadd.f32 %v605_v60, %v1710_v40  ;;  %v617_v62 = vsel %vm417_vm2, %v611_v59, -inf }
 0x309   :  { %618 = vmax.xlane.f32.xlu0 %v617_v62 }
 0x30a   :  { %v614_v63 = vsel %vm417_vm2, %v606_v61, -inf }
 0x30b   :  { %615 = vmax.xlane.f32.xlu1 %v614_v63  ;;  %v433_v63 = vsel %vm417_vm2, %v1727_v54, 0.0 }
 0x31c   :  { %736 = vrot.lane.b32.xlu1 %v1673_v28, %s1525_s8 }
 0x31f   :  { %634 = vrot.lane.b32.xlu0 %v1694_v34, %s1524_s2 }
 0x320   :  { %738 = vrot.lane.b32.xlu1 %v1686_v30, %s1525_s8 }
 0x324   :  { %845 = vrot.lane.b32.xlu1 %v1694_v34, %s1525_s8 }
 0x392   :  { %v619_v2 = vpop.xlane.xlu0 %618 }
 0x393   :  { %v621_v3 = vsub.f32 %v611_v59, %v619_v2 }
 0x394   :  { %v616_v4 = vpop.xlane.xlu1 %615 }
 0x395   :  { %v620_v5 = vsub.f32 %v606_v61, %v616_v4  ;;  %v624_v6 = vmul.f32 1.442695, %v621_v3 }
 0x396   :  { %v635_v7 = vpop.permute.xlu0 %634 }
 0x397   :  { %v622_v8 = vmul.f32 1.442695, %v620_v5  ;;  %1418 = vmatprep.subr.mxu0 %v635_v7 }
 0x398   :  { %1419 = vmatpush3.msra.mxu0 %v635_v7  ;;  %v737_v11 = vpop.permute.xlu1 %736 }
 0x399   :  { %1474 = vpow2.f32 %v622_v8  ;;  %1423 = vmatprep.subr.msk.mxu0 %vm329_vm1, %v743_v0 }
 0x39a   :  { %1476 = vpow2.f32 %v624_v6 }
 0x39c   :  { %v739_v12 = vpop.permute.xlu1 %738 }
 0x3a0   :  { %v846_v21 = vpop.permute.xlu1 %845 }
 0x3a6   :  { %v1753_v9 = vpop.eup %1474 }
 0x3a7   :  { %v1755_v10 = vpop.eup %1476  ;;  %1420 = vmatprep.mubr.msk.f32.mxu0 %vm417_vm2, %v1753_v9 }
 0x3a8   :  { %1421 = vmatmul.mubr.msk.f32.vlgmr.msra.gmra.mxu0 %vm417_vm2, %v1755_v10  ;;  %v629_v47 = vsel %vm417_vm2, %v1755_v10, 0.0 }
 0x3a9   :  { %1424 = vmatpush3.xpose.msk.msra.mxu0 %vm329_vm1, %v743_v0  ;;  %1427 = vmatprep.mubr.msk.f32.mxu0 %vm329_vm1, %v737_v11  ;;  %v430_v0 = vsel %vm417_vm2, %v1723_v53, 0.0 }
 0x3aa   :  { %1425 = vmatprep.subr.msk.mxu0 %vm329_vm1, %v741_v1 }
 0x3ad   :  { %1426 = vmatpush3.xpose.msk.msra.mxu0 %vm329_vm1, %v741_v1 }
 0x3b0   :  { %1428 = vmatmul.mubr.msk.f32.vlgmr.msra.gmra.mxu0 %vm329_vm1, %v739_v12 }
 0x468   :  { %v1766_v13 = vpop.f32.mrf.mxu0 }
 0x46a   :  { %v1768_v14 = vpop.f32.mrf.mxu0 }
 0x470   :  { %v1429_v15 = vpop.f32.mrf.mxu0 }
 0x471   :  { %v824_v16 = vadd.f32 %v1429_v15, %v1715_v41 }
 0x472   :  { %v818_v17 = vpop.f32.mrf.mxu0 }
 0x473   :  { %v819_v18 = vadd.f32 %v818_v17, %v1710_v40  ;;  %v830_v19 = vsel %vm417_vm2, %v824_v16, -inf }
 0x474   :  { %831 = vmax.xlane.f32.xlu0 %v830_v19 }
 0x475   :  { %v827_v20 = vsel %vm417_vm2, %v819_v18, -inf }
 0x476   :  { %828 = vmax.xlane.f32.xlu1 %v827_v20 }
 0x487   :  { %953 = vrot.lane.b32.xlu1 %v1663_v22, %s1526_s3 }
 0x48a   :  { %847 = vrot.lane.b32.xlu0 %v1688_v32, %s1525_s8 }
 0x48b   :  { %947 = vrot.lane.b32.xlu1 %v1673_v28, %s1526_s3 }
 0x48e   :  { %951 = vrot.lane.b32.xlu0 %v1665_v25, %s1526_s3 }
 0x492   :  { %949 = vrot.lane.b32.xlu0 %v1686_v30, %s1526_s3 }
 0x4fd   :  { %v832_v23 = vpop.xlane.xlu0 %831 }
 0x4fe   :  { %v834_v24 = vsub.f32 %v824_v16, %v832_v23 }
 0x4ff   :  { %v829_v26 = vpop.xlane.xlu1 %828 }
 0x500   :  { %v833_v27 = vsub.f32 %v819_v18, %v829_v26  ;;  %v837_v29 = vmul.f32 1.442695, %v834_v24  ;;  %v1161_v24 = vld [vmem:[%s1858_s10 + $0x8] sm:$0xff]  ;;  %v1160_v26 = vld [vmem:[%s1858_s10] sm:$0xff] }
 0x501   :  { %v848_v31 = vpop.permute.xlu0 %847 }
 0x502   :  { %v835_v22 = vmul.f32 1.442695, %v833_v27  ;;  %1430 = vmatprep.subr.mxu1 %v848_v31 }
 0x503   :  { %1431 = vmatpush3.msra.mxu1 %v848_v31  ;;  %v954_v28 = vpop.permute.xlu1 %953 }
 0x504   :  { %1478 = vpow2.f32 %v835_v22  ;;  %1432 = vmatprep.subr.mxu1 %v846_v21 }
 0x505   :  { %1480 = vpow2.f32 %v837_v29  ;;  %1433 = vmatpush3.msra.mxu1 %v846_v21  ;;  %v952_v35 = vpop.permute.xlu0 %951 }
 0x506   :  { %1437 = vmatprep.subr.msk.mxu1 %vm329_vm1, %v954_v28 }
 0x507   :  { %v948_v30 = vpop.permute.xlu1 %947 }
 0x509   :  { %v950_v36 = vpop.permute.xlu0 %949 }
 0x511   :  { %v1479_v25 = vpop.eup %1478 }
 0x512   :  { %v1481_v33 = vpop.eup %1480  ;;  %1434 = vmatprep.mubr.msk.f32.mxu1 %vm417_vm2, %v1479_v25 }
 0x513   :  { %1435 = vmatmul.mubr.msk.f32.vlgmr.msra.gmra.mxu1 %vm417_vm2, %v1481_v33  ;;  %v842_v48 = vsel %vm417_vm2, %v1481_v33, 0.0 }
 0x514   :  { %1438 = vmatpush3.xpose.msk.msra.mxu1 %vm329_vm1, %v954_v28  ;;  %1441 = vmatprep.mubr.msk.f32.mxu1 %vm329_vm1, %v948_v30 }
 0x515   :  { %1439 = vmatprep.subr.msk.mxu1 %vm329_vm1, %v952_v35 }
 0x518   :  { %1440 = vmatpush3.xpose.msk.msra.mxu1 %vm329_vm1, %v952_v35 }
 0x51b   :  { %1442 = vmatmul.mubr.msk.f32.vlgmr.msra.gmra.mxu1 %vm329_vm1, %v950_v36 }
 0x5d3   :  { %v1792_v37 = vpop.f32.mrf.mxu1 }
 0x5d5   :  { %v923_v38 = vpop.f32.mrf.mxu1 }
 0x5db   :  { %v1443_v39 = vpop.f32.mrf.mxu1 }
 0x5dc   :  { %v1035_v42 = vadd.f32 %v1443_v39, %v1715_v41  ;;  %v626_v41 = vsel %vm417_vm2, %v1753_v9, 0.0 }
 0x5dd   :  { %v1029_v43 = vpop.f32.mrf.mxu1 }
 0x5de   :  { %v1030_v44 = vadd.f32 %v1029_v43, %v1710_v40  ;;  %v1041_v45 = vsel %vm417_vm2, %v1035_v42, -inf  ;;  %v839_v40 = vsel %vm417_vm2, %v1479_v25, 0.0 }
 0x5df   :  { %1042 = vmax.xlane.f32.xlu0 %v1041_v45 }
 0x5e0   :  { %v1038_v46 = vsel %vm417_vm2, %v1030_v44, -inf }
 0x5e1   :  { %1039 = vmax.xlane.f32.xlu1 %v1038_v46 }
 0x5f2   :  { %1056 = vrot.lane.b32.xlu1 %v1694_v34, %s1526_s3 }
 0x5f5   :  { %1058 = vrot.lane.b32.xlu0 %v1688_v32, %s1526_s3 }
 0x614   :  { %630 = vadd.xlane.f32.xlu0 %v629_v47 }
 0x616   :  { %627 = vadd.xlane.f32.xlu1 %v626_v41 }
 0x618   :  { %840 = vadd.xlane.f32.xlu0 %v839_v40 }
 0x61a   :  { %843 = vadd.xlane.f32.xlu1 %v842_v48 }
 0x668   :  { %v1043_v49 = vpop.xlane.xlu0 %1042 }
 0x669   :  { %v1045_v50 = vsub.f32 %v1035_v42, %v1043_v49 }
 0x66a   :  { %v1040_v34 = vpop.xlane.xlu1 %1039 }
 0x66b   :  { %v1048_v51 = vmul.f32 1.442695, %v1045_v50  ;;  %v1044_v52 = vsub.f32 %v1030_v44, %v1040_v34 }
 0x66c   :  { %v1059_v32 = vpop.permute.xlu0 %1058 }
 0x66d   :  { %1482 = vpow2.f32 %v1048_v51  ;;  %v1046_v55 = vmul.f32 1.442695, %v1044_v52  ;;  %1444 = vmatprep.subr.mxu0 %v1059_v32 }
 0x66e   :  { %1445 = vmatpush3.msra.mxu0 %v1059_v32  ;;  %v1057_v58 = vpop.permute.xlu1 %1056 }
 0x66f   :  { %1484 = vpow2.f32 %v1046_v55  ;;  %1446 = vmatprep.subr.mxu0 %v1057_v58 }
 0x670   :  { %1447 = vmatpush3.msra.mxu0 %v1057_v58 }
 0x67a   :  { %v1483_v59 = vpop.eup %1482 }
 0x67b   :  { %v1053_v60 = vsel %vm417_vm2, %v1483_v59, 0.0 }
 0x67c   :  { %v1485_v61 = vpop.eup %1484  ;;  %1054 = vadd.xlane.f32.xlu1 %v1053_v60 }
 0x67d   :  { %1448 = vmatprep.mubr.msk.f32.mxu0 %vm417_vm2, %v1485_v61  ;;  %v1050_v62 = vsel %vm417_vm2, %v1485_v61, 0.0 }
 0x67e   :  { %1051 = vadd.xlane.f32.xlu0 %v1050_v62  ;;  %1449 = vmatmul.mubr.msk.f32.vlgmr.msra.gmra.mxu0 %vm417_vm2, %v1483_v59 }
 0x680   :  { %434 = vadd.xlane.f32.xlu1 %v433_v63 }
 0x682   :  { %431 = vadd.xlane.f32.xlu0 %v430_v0 }
 0x69d   :  { %v631_v1 = vpop.xlane.xlu0 %630 }
 0x69e   :  { %1486 = vrcp.f32 %v631_v1 }
 0x69f   :  { %v628_v2 = vpop.xlane.xlu1 %627 }
 0x6a0   :  { %1488 = vrcp.f32 %v628_v2 }
 0x6a1   :  { %v841_v3 = vpop.xlane.xlu0 %840 }
 0x6a2   :  { %1490 = vrcp.f32 %v841_v3 }
 0x6a3   :  { %v844_v4 = vpop.xlane.xlu1 %843 }
 0x6a4   :  { %1492 = vrcp.f32 %v844_v4 }
 0x6ab   :  { %v1487_v5 = vpop.eup %1486 }
 0x6ac   :  { %v724_v6 = vmul.f32 %v1487_v5, %v1766_v13 }
 0x6ad   :  { %v1489_v7 = vpop.eup %1488 }
 0x6ae   :  { %729 = vrot.lane.b32.xlu1 %v724_v6, %s1527_s23  ;;  %v723_v54 = vmul.f32 %v1489_v7, %v1768_v14 }
 0x6af   :  { %v1491_v8 = vpop.eup %1490 }
 0x6b0   :  { %727 = vrot.lane.b32.xlu0 %v723_v54, %s1527_s23  ;;  %v934_v53 = vmul.f32 %v1491_v8, %v923_v38 }
 0x6b1   :  { %v1493_v9 = vpop.eup %1492 }
 0x6b2   :  { %938 = vrot.lane.b32.xlu1 %v934_v53, %s1528_s4  ;;  %v935_v10 = vmul.f32 %v1493_v9, %v1792_v37  ;;  %v1303_v37 = vld [vmem:[%s1859_s11] ss:$0 sm:$0xff] }
 0x6b4   :  { %940 = vrot.lane.b32.xlu0 %v935_v10, %s1528_s4 }
 0x705   :  { %v1055_v11 = vpop.xlane.xlu1 %1054 }
 0x707   :  { %v1052_v12 = vpop.xlane.xlu0 %1051 }
 0x709   :  { %v435_v15 = vpop.xlane.xlu1 %434 }
 0x70a   :  { %1494 = vrcp.f32 %v435_v15 }
 0x70b   :  { %v432_v13 = vpop.xlane.xlu0 %431 }
 0x70c   :  { %1496 = vrcp.f32 %v432_v13 }
 0x70d   :  { %1498 = vrcp.f32 %v1055_v11 }
 0x70e   :  { %1500 = vrcp.f32 %v1052_v12 }
 0x717   :  { %v1495_v16 = vpop.eup %1494 }
 0x718   :  { %v520_v17 = vmul.f32 %v1495_v16, %v1736_v56  ;;  %v1163_v56 = vld [vmem:[%s1858_s10 + $0x18] sm:$0xff] }
 0x719   :  { %v1497_v14 = vpop.eup %1496  ;;  %1451 = vmatprep.subr.mxu0 %v1163_v56 }
 0x71a   :  { %522 = vst.msk [vmem:[#allocation2 + $0x8] sm:$0xff] %vm329_vm1, %v520_v17  ;;  %v519_v18 = vmul.f32 %v1497_v14, %v1738_v57  ;;  %v1162_v57 = vld [vmem:[%s1858_s10 + $0x10] sm:$0xff]  ;;  %1452 = vmatpush3.msra.mxu0 %v1163_v56  ;;  %v1499_v27 = vpop.eup %1498 }
 0x71b   :  { %1453 = vmatprep.subr.mxu0 %v1162_v57  ;;  %v1501_v22 = vpop.eup %1500 }
 0x71c   :  { %521 = vst.msk [vmem:[#allocation2] sm:$0xff] %vm329_vm1, %v519_v18  ;;  %1454 = vmatpush3.msra.mxu0 %v1162_v57 }
 0x71d   :  { %1455 = vmatprep.subr.mxu0 %v1161_v24 }
 0x71e   :  { %1456 = vmatpush3.msra.mxu0 %v1161_v24 }
 0x71f   :  { %1457 = vmatprep.subr.mxu0 %v1160_v26 }
 0x720   :  { %v730_v19 = vpop.permute.xlu1 %729  ;;  %1458 = vmatpush3.msra.mxu0 %v1160_v26 }
 0x721   :  { %735 = vst.msk [vmem:[#allocation2 + $0x8] sm:$0xff] %vm733_vm3, %v730_v19 }
 0x722   :  { %v728_v20 = vpop.permute.xlu0 %727 }
 0x723   :  { %734 = vst.msk [vmem:[#allocation2] sm:$0xff] %vm733_vm3, %v728_v20 }
 0x724   :  { %v939_v21 = vpop.permute.xlu1 %938 }
 0x725   :  { %945 = vst.msk [vmem:[#allocation2] sm:$0xff] %vm944_vm4, %v939_v21 }
 0x726   :  { %v941_v23 = vpop.permute.xlu0 %940 }
 0x727   :  { %946 = vst.msk [vmem:[#allocation2 + $0x8] sm:$0xff] %vm944_vm4, %v941_v23 }
 0x73e   :  { %v1450_v29 = vpop.f32.mrf.mxu0 }
 0x73f   :  { %v1146_v31 = vmul.f32 %v1499_v27, %v1450_v29 }
 0x740   :  { %v1134_v28 = vpop.f32.mrf.mxu0 }
 0x741   :  { %v1145_v25 = vmul.f32 %v1501_v22, %v1134_v28  ;;  %1151 = vrot.lane.b32.xlu0 %v1146_v31, %s1529_s30 }
 0x743   :  { %1149 = vrot.lane.b32.xlu1 %v1145_v25, %s1529_s30 }
 0x7b3   :  { %v1152_v33 = vpop.permute.xlu0 %1151 }
 0x7b4   :  { %1157 = vst.msk [vmem:[#allocation2 + $0x8] sm:$0xff] %vm1155_vm5, %v1152_v33 }
 0x7b5   :  { %v1150_v30 = vpop.permute.xlu1 %1149 }
 0x7b6   :  { %1156 = vst.msk [vmem:[#allocation2] sm:$0xff] %vm1155_vm5, %v1150_v30 }
 0x7bb   :  { %v1159_v36 = vld [vmem:[#allocation2 + $0x8] sm:$0xff] }
 0x7bd   :  { %v1158_v35 = vld [vmem:[#allocation2] sm:$0xff] }
 0x7be   :  { %1459 = vmatprep.mubr.msk.f32.mxu0 %vm61_vm0, %v1158_v35 }
 0x7bf   :  { %1460 = vmatmul.mubr.msk.f32.vlgmr.msra.gmra.mxu0 %vm61_vm0, %v1159_v36 }
 0x87f   :  { %v1461_v38 = vpop.f32.mrf.mxu0 }
 0x880   :  { %v1249_v39 = vadd.f32 %v1461_v38, %v1303_v37 }
 0x881   :  { %v1243_v42 = vpop.f32.mrf.mxu0 }
 0x882   :  { %1253 = vst.msk [vmem:[#allocation3 + $0x8] sm:$0xff] %vm61_vm0, %v1249_v39  ;;  %v1244_v43 = vadd.f32 %v1303_v37, %v1243_v42 }
 0x884   :  { %1252 = vst.msk [vmem:[#allocation3] sm:$0xff] %vm61_vm0, %v1244_v43 }
 0x885   :  { %1513 = shalt.err (!%p1510_p4)
}
 0x886   :  { %s1531_s17 = smov 128  }
 0x887   :  { %1265 = dma.vmem_to_hbm [thread:$0]  %s1260_s15, 256, %s1860_s12, [#allocation4], %s1531_s17, %s1531_s17, %s1527_s23  }
 0x888   :  { %1522 = dma.done.wait [#allocation4], 256  }
 0x889   :  { %1523 = vsyncadd [#allocation4], 4294967040 }
 0x88a   :  { %1269 = vsyncpa [#allocation4], 1 }

</bundles_post_ra>
